<compile_context>
chip_gen: v6e
topology: v6e:2x2x1
jax: 0.10.0
libtpu: 0.0.40
codegen_flags: <defaults>
</compile_context>

<pallas_src>
import functools

import jax
import jax.numpy as jnp
from jax import lax
from jax.experimental import pallas as pl
from jax.experimental.pallas import tpu as pltpu


def _round_up(x, m):
    return (x + m - 1) // m * m


def _largest_divisor_leq(n, cap):
    d = max(1, min(n, cap))
    while n % d != 0:
        d -= 1
    return d


# ---------------------------------------------------------------------------
# Kernel 1: the serial tanh recurrence.
#   grid = (batch_blocks, time_chunks)  --  ("parallel", "arbitrary")
# ---------------------------------------------------------------------------
def _rnn_recurrence_kernel(x_ref,     # (t_block, b_block, H): (W_ih+b)[tok], pre-gathered, pipelined
                           whh_ref,   # (H, H): unblocked, VMEM resident, f32
                           h0_ref,    # (b_block, H): initial hidden state for this batch block
                           y_ref,     # (t_block, b_block, H): hidden states out
                           h_carry,   # VMEM scratch (b_block, H) f32, persists across time chunks
                           *, t_block):
    c = pl.program_id(1)              # time-chunk index (serial)

    @pl.when(c == 0)
    def _():                          # new batch block -> (re)load the initial state
        h_carry[...] = h0_ref[...]

    whh = whh_ref[...]                # hoisted: resident for the whole chunk

    def step(t, h):
        # x_ref[t] already holds x_t @ W_ih^T + b_ih + b_hh, so only the
        # (b_block,H)@(H,H) matmul + tanh sit on the h_t -> h_{t+1} chain.
        h_new = jnp.tanh(x_ref[t].astype(jnp.float32)
                         + jnp.dot(h, whh, preferred_element_type=jnp.float32))
        y_ref[t] = h_new.astype(y_ref.dtype)
        return h_new

    h_carry[...] = lax.fori_loop(0, t_block, step, h_carry[...], unroll=True)


# ---------------------------------------------------------------------------
# Kernel 2: dense head  logits = hidden @ W_d^T + b_d, tiled over (rows, vocab).
# ---------------------------------------------------------------------------
def _dense_kernel(h_ref, wd_ref, bd_ref, o_ref):
    o_ref[...] = (jnp.dot(h_ref[...], wd_ref[...],
                          preferred_element_type=jnp.float32)
                  + bd_ref[...]).astype(o_ref.dtype)


def rnn_model_forward(inputs, state, params, *, use_bf16=False,
                      max_b_block=128, max_t_block=32,
                      vmem_limit_bytes=48 * 1024 * 1024):
    """Pallas equivalent of RNNModel.forward.

    inputs: (seq_len, batch) int token ids (time-major, like nn.RNN default).
    state:  (1, batch, hidden) float32 initial hidden state, or None (-> zeros).
    params: (w_ih, w_hh, b_ih, b_hh, w_d, b_d), stored pre-transposed relative to
            PyTorch: (V,H), (H,H), (1,H), (1,H), (H,V), (1,V).
    Returns (logits (seq_len*batch, vocab) f32, new_state (1, batch, hidden) f32).

    use_bf16: stream the gathered input rows / stored hidden / W_d as bf16 with
              f32 accumulation; W_hh and the carried h stay f32.
    max_b_block: rows per batch block (128 is safe on all generations; 256 can
              help v6e/v7x's 256-wide MXU when batch allows it).
    """
    w_ih, w_hh, b_ih, b_hh, w_d, b_d = params
    seq_len, batch = inputs.shape
    vocab, hidden = w_ih.shape

    if state is None:
        state = jnp.zeros((1, batch, hidden), jnp.float32)

    x_dtype = jnp.bfloat16 if use_bf16 else jnp.float32
    wd_dtype = jnp.bfloat16 if use_bf16 else jnp.float32

    # ---- Tiling -------------------------------------------------------------
    b_pad = _round_up(batch, 8)
    # NOTE: on v7x prefer a b_block that yields >= 2 batch blocks so the
    # "parallel" axis spans both TensorCores (needs batch >= 16).
    b_block = 8 * _largest_divisor_leq(b_pad // 8, max(1, max_b_block // 8))
    nb = b_pad // b_block
    t_block = min(max_t_block, _round_up(seq_len, 8))
    seq_pad = _round_up(seq_len, t_block)
    nc = seq_pad // t_block

    # ---- Host-side prep (cheap XLA ops, off the serial path) ----------------
    # Fold both RNN biases into the embedding rows: x_t is one-hot, so
    # x_t @ W_ih^T + b_ih + b_hh == (W_ih + b_ih + b_hh)[token].
    w_ih_b = (w_ih + b_ih + b_hh).astype(x_dtype)                 # (V, H)

    ids = jnp.zeros((seq_pad, b_pad), jnp.int32)
    ids = ids.at[:seq_len, :batch].set(inputs.astype(jnp.int32))
    x_rows = jnp.take(w_ih_b, ids, axis=0)                        # (seq_pad, b_pad, H)

    h0 = jnp.zeros((b_pad, hidden), jnp.float32)
    h0 = h0.at[:batch].set(state[0].astype(jnp.float32))

    # ---- Kernel 1: the recurrence -------------------------------------------
    hidden_seq = pl.pallas_call(
        functools.partial(_rnn_recurrence_kernel, t_block=t_block),
        out_shape=jax.ShapeDtypeStruct((seq_pad, b_pad, hidden), x_dtype),
        grid=(nb, nc),
        in_specs=[
            pl.BlockSpec((t_block, b_block, hidden), lambda b, c: (c, b, 0)),
            pl.BlockSpec(memory_space=pltpu.MemorySpace.VMEM),    # W_hh: single VMEM copy
            pl.BlockSpec((b_block, hidden), lambda b, c: (b, 0)),
        ],
        out_specs=pl.BlockSpec((t_block, b_block, hidden), lambda b, c: (c, b, 0)),
        scratch_shapes=[pltpu.VMEM((b_block, hidden), jnp.float32)],
        compiler_params=pltpu.CompilerParams(
            dimension_semantics=("parallel", "arbitrary"),        # batch parallel, time serial
            vmem_limit_bytes=vmem_limit_bytes),
    )(x_rows, w_hh.astype(jnp.float32), h0)

    # Final hidden state = hidden at the last *valid* step (padded steps never
    # feed into it; exact).
    h_n = hidden_seq[seq_len - 1, :batch, :].astype(jnp.float32)[None]

    # ---- Kernel 2: dense head on the valid rows only -------------------------
    rows = seq_len * batch
    rows_pad = _round_up(rows, 8)
    h_flat = jnp.zeros((rows_pad, hidden), x_dtype)
    h_flat = h_flat.at[:rows].set(hidden_seq[:seq_len, :batch, :].reshape(rows, hidden))

    tm = 8 * _largest_divisor_leq(rows_pad // 8, 64)              # <= 512 rows / tile
    if vocab % 128 == 0:
        tv = 128 * _largest_divisor_leq(vocab // 128, 4)          # <= 512 lanes / tile
    else:
        tv = vocab                                                # single full-width block
    nm, nv = rows_pad // tm, vocab // tv

    logits = pl.pallas_call(
        _dense_kernel,
        out_shape=jax.ShapeDtypeStruct((rows_pad, vocab), jnp.float32),
        grid=(nm, nv),
        in_specs=[
            pl.BlockSpec((tm, hidden), lambda i, j: (i, 0)),
            pl.BlockSpec((hidden, tv), lambda i, j: (0, j)),
            pl.BlockSpec((1, tv), lambda i, j: (0, j)),
        ],
        out_specs=pl.BlockSpec((tm, tv), lambda i, j: (i, j)),
        compiler_params=pltpu.CompilerParams(
            dimension_semantics=("parallel", "parallel"),
            vmem_limit_bytes=vmem_limit_bytes),
    )(h_flat, w_d.astype(wd_dtype), b_d.reshape(1, vocab).astype(jnp.float32))

    return logits[:rows], h_n


def _ref_forward(inputs, state, params):
    """Pure-JAX reference mirroring RNNModel.forward (full f32 precision)."""
    w_ih, w_hh, b_ih, b_hh, w_d, b_d = params
    vocab = w_ih.shape[0]
    hp = jax.lax.Precision.HIGHEST
    X = jax.nn.one_hot(inputs, vocab, dtype=jnp.float32)          # (T, B, V)

    def step(h, x):
        h_new = jnp.tanh(jnp.dot(x, w_ih, precision=hp)
                         + jnp.dot(h, w_hh, precision=hp) + b_ih + b_hh)
        return h_new, h_new

    h_last, Y = lax.scan(step, state[0], X)
    out = jnp.dot(Y.reshape(-1, Y.shape[-1]), w_d, precision=hp) + b_d
    return out, h_last[None]


def _run_and_check(seq_len, batch, vocab, hidden, key):
    ks = jax.random.split(key, 8)
    bound = 1.0 / float(hidden ** 0.5)
    # Weights stored pre-transposed relative to PyTorch (so kernels do x @ W).
    w_ih = jax.random.uniform(ks[0], (vocab, hidden), jnp.float32, -bound, bound)
    w_hh = jax.random.uniform(ks[1], (hidden, hidden), jnp.float32, -bound, bound)
    b_ih = jax.random.uniform(ks[2], (1, hidden), jnp.float32, -bound, bound)
    b_hh = jax.random.uniform(ks[3], (1, hidden), jnp.float32, -bound, bound)
    w_d = jax.random.uniform(ks[4], (hidden, vocab), jnp.float32, -bound, bound)
    b_d = jax.random.uniform(ks[5], (1, vocab), jnp.float32, -bound, bound)
    params = (w_ih, w_hh, b_ih, b_hh, w_d, b_d)

    inputs = jax.random.randint(ks[6], (seq_len, batch), 0, vocab, dtype=jnp.int32)
    h0 = jnp.zeros((1, batch, hidden), jnp.float32)               # state=None -> zeros

    out, h_n = rnn_model_forward(inputs, h0, params)
    out = jax.block_until_ready(out)
    h_n = jax.block_until_ready(h_n)

    ref_out, ref_h = _ref_forward(inputs, h0, params)
    assert out.shape == (seq_len * batch, vocab)
    assert h_n.shape == (1, batch, hidden)
    err_o = float(jnp.max(jnp.abs(out - ref_out)))
    err_h = float(jnp.max(jnp.abs(h_n - ref_h)))
    assert err_o < 1e-4, f"logits mismatch: max abs err = {err_o}"
    assert err_h < 1e-4, f"h_n mismatch: max abs err = {err_h}"


if __name__ == "__main__":
    key = jax.random.PRNGKey(0)
    k1, k2 = jax.random.split(key)

    # Main toy config implied by the module.
    _run_and_check(seq_len=8, batch=2, vocab=16, hidden=32, key=k1)
    # Odd sizes: exercises the seq_len / batch padding paths.
    _run_and_check(seq_len=5, batch=3, vocab=16, hidden=32, key=k2)

    # TODO(synk): `predict` (autoregressive sampling with torch.multinomial) is
    # host-side control flow and is not part of the Pallas kernels.
    print("KERNEL_OK")
</pallas_src>

<mosaic_0001>
module attributes {stable_mosaic.version = 11 : i64} {
  func.func @_rnn_recurrence_kernel(%arg0: i32, %arg1: i32, %arg2: memref<8x8x32xf32, #tpu.memory_space<vmem>>, %arg3: memref<32x32xf32, #tpu.memory_space<vmem>>, %arg4: memref<8x32xf32, #tpu.memory_space<vmem>>, %arg5: memref<8x8x32xf32, #tpu.memory_space<vmem>>, %arg6: memref<8x32xf32, #tpu.memory_space<vmem>>) attributes {dimension_semantics = [#tpu.dimension_semantics<parallel>, #tpu.dimension_semantics<arbitrary>], iteration_bounds = array<i64: 1, 1>, scalar_prefetch = 0 : i64, scratch_operands = 1 : i64, tpu.core_type = #tpu.core_type<tc>, window_params = [{transform_indices = @transform_0, window_bounds = array<i64: 8, 8, 32>}, {pipeline_mode = #tpu.pipeline_mode<synchronous>, transform_indices = @transform_1, window_bounds = array<i64: 32, 32>}, {transform_indices = @transform_2, window_bounds = array<i64: 8, 32>}, {transform_indices = @transform_3, window_bounds = array<i64: 8, 8, 32>}]} {
    %c0_i32 = arith.constant 0 : i32
    %0 = arith.cmpi eq, %arg1, %c0_i32 : i32
    %1 = arith.extui %0 : i1 to i32
    %c0_i32_0 = arith.constant 0 : i32
    %2 = arith.cmpi ne, %1, %c0_i32_0 : i32
    scf.if %2 {
      %c0_46 = arith.constant 0 : index
      %c0_47 = arith.constant 0 : index
      %86 = vector.load %arg4[%c0_46, %c0_47] : memref<8x32xf32, #tpu.memory_space<vmem>>, vector<8x32xf32>
      %c0_48 = arith.constant 0 : index
      %c0_49 = arith.constant 0 : index
      %87 = vector.load %arg6[%c0_48, %c0_49] : memref<8x32xf32, #tpu.memory_space<vmem>>, vector<8x32xf32>
      tpu.vector_store %arg6[%c0_48, %c0_49], %86 {strides = array<i32>} : memref<8x32xf32, #tpu.memory_space<vmem>>, vector<8x32xf32>,
    } else {
    }
    %c0 = arith.constant 0 : index
    %c0_1 = arith.constant 0 : index
    %3 = vector.load %arg3[%c0, %c0_1] : memref<32x32xf32, #tpu.memory_space<vmem>>, vector<32x32xf32>
    %c0_2 = arith.constant 0 : index
    %c0_3 = arith.constant 0 : index
    %4 = vector.load %arg6[%c0_2, %c0_3] : memref<8x32xf32, #tpu.memory_space<vmem>>, vector<8x32xf32>
    %c0_i32_4 = arith.constant 0 : i32
    %5 = arith.index_cast %c0_i32_4 : i32 to index
    %c0_5 = arith.constant 0 : index
    %c0_6 = arith.constant 0 : index
    %6 = vector.load %arg2[%5, %c0_5, %c0_6] : memref<8x8x32xf32, #tpu.memory_space<vmem>>, vector<1x8x32xf32>
    %7 = vector.shape_cast %6 : vector<1x8x32xf32> to vector<8x32xf32>
    %cst = arith.constant dense<0.000000e+00> : vector<8x32xf32>
    %8 = tpu.matmul %4, %3, %cst {dimension_numbers = #tpu.dot_dimension_numbers<[1], [0], [0], [1], [0, 0, 1, 1], [], []>} : vector<8x32xf32>, vector<32x32xf32>, vector<8x32xf32> -> vector<8x32xf32>
    %9 = arith.addf %7, %8 : vector<8x32xf32>
    %10 = math.tanh %9 : vector<8x32xf32>
    %11 = arith.index_cast %c0_i32_4 : i32 to index
    %c0_7 = arith.constant 0 : index
    %c0_8 = arith.constant 0 : index
    %12 = vector.load %arg5[%11, %c0_7, %c0_8] : memref<8x8x32xf32, #tpu.memory_space<vmem>>, vector<1x8x32xf32>
    %13 = vector.shape_cast %12 : vector<1x8x32xf32> to vector<8x32xf32>
    %14 = vector.shape_cast %10 : vector<8x32xf32> to vector<1x8x32xf32>
    tpu.vector_store %arg5[%11, %c0_7, %c0_8], %14 {strides = array<i32>} : memref<8x8x32xf32, #tpu.memory_space<vmem>>, vector<1x8x32xf32>,
    %c1_i32 = arith.constant 1 : i32
    %15 = arith.index_cast %c1_i32 : i32 to index
    %c0_9 = arith.constant 0 : index
    %c0_10 = arith.constant 0 : index
    %16 = vector.load %arg2[%15, %c0_9, %c0_10] : memref<8x8x32xf32, #tpu.memory_space<vmem>>, vector<1x8x32xf32>
    %17 = vector.shape_cast %16 : vector<1x8x32xf32> to vector<8x32xf32>
    %cst_11 = arith.constant dense<0.000000e+00> : vector<8x32xf32>
    %18 = tpu.matmul %10, %3, %cst_11 {dimension_numbers = #tpu.dot_dimension_numbers<[1], [0], [0], [1], [0, 0, 1, 1], [], []>} : vector<8x32xf32>, vector<32x32xf32>, vector<8x32xf32> -> vector<8x32xf32>
    %19 = arith.addf %17, %18 : vector<8x32xf32>
    %20 = math.tanh %19 : vector<8x32xf32>
    %21 = arith.index_cast %c1_i32 : i32 to index
    %c0_12 = arith.constant 0 : index
    %c0_13 = arith.constant 0 : index
    %22 = vector.load %arg5[%21, %c0_12, %c0_13] : memref<8x8x32xf32, #tpu.memory_space<vmem>>, vector<1x8x32xf32>
    %23 = vector.shape_cast %22 : vector<1x8x32xf32> to vector<8x32xf32>
    %24 = vector.shape_cast %20 : vector<8x32xf32> to vector<1x8x32xf32>
    tpu.vector_store %arg5[%21, %c0_12, %c0_13], %24 {strides = array<i32>} : memref<8x8x32xf32, #tpu.memory_space<vmem>>, vector<1x8x32xf32>,
    %c2_i32 = arith.constant 2 : i32
    %25 = arith.index_cast %c2_i32 : i32 to index
    %c0_14 = arith.constant 0 : index
    %c0_15 = arith.constant 0 : index
    %26 = vector.load %arg2[%25, %c0_14, %c0_15] : memref<8x8x32xf32, #tpu.memory_space<vmem>>, vector<1x8x32xf32>
    %27 = vector.shape_cast %26 : vector<1x8x32xf32> to vector<8x32xf32>
    %cst_16 = arith.constant dense<0.000000e+00> : vector<8x32xf32>
    %28 = tpu.matmul %20, %3, %cst_16 {dimension_numbers = #tpu.dot_dimension_numbers<[1], [0], [0], [1], [0, 0, 1, 1], [], []>} : vector<8x32xf32>, vector<32x32xf32>, vector<8x32xf32> -> vector<8x32xf32>
    %29 = arith.addf %27, %28 : vector<8x32xf32>
    %30 = math.tanh %29 : vector<8x32xf32>
    %31 = arith.index_cast %c2_i32 : i32 to index
    %c0_17 = arith.constant 0 : index
    %c0_18 = arith.constant 0 : index
    %32 = vector.load %arg5[%31, %c0_17, %c0_18] : memref<8x8x32xf32, #tpu.memory_space<vmem>>, vector<1x8x32xf32>
    %33 = vector.shape_cast %32 : vector<1x8x32xf32> to vector<8x32xf32>
    %34 = vector.shape_cast %30 : vector<8x32xf32> to vector<1x8x32xf32>
    tpu.vector_store %arg5[%31, %c0_17, %c0_18], %34 {strides = array<i32>} : memref<8x8x32xf32, #tpu.memory_space<vmem>>, vector<1x8x32xf32>,
    %c3_i32 = arith.constant 3 : i32
    %35 = arith.index_cast %c3_i32 : i32 to index
    %c0_19 = arith.constant 0 : index
    %c0_20 = arith.constant 0 : index
    %36 = vector.load %arg2[%35, %c0_19, %c0_20] : memref<8x8x32xf32, #tpu.memory_space<vmem>>, vector<1x8x32xf32>
    %37 = vector.shape_cast %36 : vector<1x8x32xf32> to vector<8x32xf32>
    %cst_21 = arith.constant dense<0.000000e+00> : vector<8x32xf32>
    %38 = tpu.matmul %30, %3, %cst_21 {dimension_numbers = #tpu.dot_dimension_numbers<[1], [0], [0], [1], [0, 0, 1, 1], [], []>} : vector<8x32xf32>, vector<32x32xf32>, vector<8x32xf32> -> vector<8x32xf32>
    %39 = arith.addf %37, %38 : vector<8x32xf32>
    %40 = math.tanh %39 : vector<8x32xf32>
    %41 = arith.index_cast %c3_i32 : i32 to index
    %c0_22 = arith.constant 0 : index
    %c0_23 = arith.constant 0 : index
    %42 = vector.load %arg5[%41, %c0_22, %c0_23] : memref<8x8x32xf32, #tpu.memory_space<vmem>>, vector<1x8x32xf32>
    %43 = vector.shape_cast %42 : vector<1x8x32xf32> to vector<8x32xf32>
    %44 = vector.shape_cast %40 : vector<8x32xf32> to vector<1x8x32xf32>
    tpu.vector_store %arg5[%41, %c0_22, %c0_23], %44 {strides = array<i32>} : memref<8x8x32xf32, #tpu.memory_space<vmem>>, vector<1x8x32xf32>,
    %c4_i32 = arith.constant 4 : i32
    %45 = arith.index_cast %c4_i32 : i32 to index
    %c0_24 = arith.constant 0 : index
    %c0_25 = arith.constant 0 : index
    %46 = vector.load %arg2[%45, %c0_24, %c0_25] : memref<8x8x32xf32, #tpu.memory_space<vmem>>, vector<1x8x32xf32>
    %47 = vector.shape_cast %46 : vector<1x8x32xf32> to vector<8x32xf32>
    %cst_26 = arith.constant dense<0.000000e+00> : vector<8x32xf32>
    %48 = tpu.matmul %40, %3, %cst_26 {dimension_numbers = #tpu.dot_dimension_numbers<[1], [0], [0], [1], [0, 0, 1, 1], [], []>} : vector<8x32xf32>, vector<32x32xf32>, vector<8x32xf32> -> vector<8x32xf32>
    %49 = arith.addf %47, %48 : vector<8x32xf32>
    %50 = math.tanh %49 : vector<8x32xf32>
    %51 = arith.index_cast %c4_i32 : i32 to index
    %c0_27 = arith.constant 0 : index
    %c0_28 = arith.constant 0 : index
    %52 = vector.load %arg5[%51, %c0_27, %c0_28] : memref<8x8x32xf32, #tpu.memory_space<vmem>>, vector<1x8x32xf32>
    %53 = vector.shape_cast %52 : vector<1x8x32xf32> to vector<8x32xf32>
    %54 = vector.shape_cast %50 : vector<8x32xf32> to vector<1x8x32xf32>
    tpu.vector_store %arg5[%51, %c0_27, %c0_28], %54 {strides = array<i32>} : memref<8x8x32xf32, #tpu.memory_space<vmem>>, vector<1x8x32xf32>,
    %c5_i32 = arith.constant 5 : i32
    %55 = arith.index_cast %c5_i32 : i32 to index
    %c0_29 = arith.constant 0 : index
    %c0_30 = arith.constant 0 : index
    %56 = vector.load %arg2[%55, %c0_29, %c0_30] : memref<8x8x32xf32, #tpu.memory_space<vmem>>, vector<1x8x32xf32>
    %57 = vector.shape_cast %56 : vector<1x8x32xf32> to vector<8x32xf32>
    %cst_31 = arith.constant dense<0.000000e+00> : vector<8x32xf32>
    %58 = tpu.matmul %50, %3, %cst_31 {dimension_numbers = #tpu.dot_dimension_numbers<[1], [0], [0], [1], [0, 0, 1, 1], [], []>} : vector<8x32xf32>, vector<32x32xf32>, vector<8x32xf32> -> vector<8x32xf32>
    %59 = arith.addf %57, %58 : vector<8x32xf32>
    %60 = math.tanh %59 : vector<8x32xf32>
    %61 = arith.index_cast %c5_i32 : i32 to index
    %c0_32 = arith.constant 0 : index
    %c0_33 = arith.constant 0 : index
    %62 = vector.load %arg5[%61, %c0_32, %c0_33] : memref<8x8x32xf32, #tpu.memory_space<vmem>>, vector<1x8x32xf32>
    %63 = vector.shape_cast %62 : vector<1x8x32xf32> to vector<8x32xf32>
    %64 = vector.shape_cast %60 : vector<8x32xf32> to vector<1x8x32xf32>
    tpu.vector_store %arg5[%61, %c0_32, %c0_33], %64 {strides = array<i32>} : memref<8x8x32xf32, #tpu.memory_space<vmem>>, vector<1x8x32xf32>,
    %c6_i32 = arith.constant 6 : i32
    %65 = arith.index_cast %c6_i32 : i32 to index
    %c0_34 = arith.constant 0 : index
    %c0_35 = arith.constant 0 : index
    %66 = vector.load %arg2[%65, %c0_34, %c0_35] : memref<8x8x32xf32, #tpu.memory_space<vmem>>, vector<1x8x32xf32>
    %67 = vector.shape_cast %66 : vector<1x8x32xf32> to vector<8x32xf32>
    %cst_36 = arith.constant dense<0.000000e+00> : vector<8x32xf32>
    %68 = tpu.matmul %60, %3, %cst_36 {dimension_numbers = #tpu.dot_dimension_numbers<[1], [0], [0], [1], [0, 0, 1, 1], [], []>} : vector<8x32xf32>, vector<32x32xf32>, vector<8x32xf32> -> vector<8x32xf32>
    %69 = arith.addf %67, %68 : vector<8x32xf32>
    %70 = math.tanh %69 : vector<8x32xf32>
    %71 = arith.index_cast %c6_i32 : i32 to index
    %c0_37 = arith.constant 0 : index
    %c0_38 = arith.constant 0 : index
    %72 = vector.load %arg5[%71, %c0_37, %c0_38] : memref<8x8x32xf32, #tpu.memory_space<vmem>>, vector<1x8x32xf32>
    %73 = vector.shape_cast %72 : vector<1x8x32xf32> to vector<8x32xf32>
    %74 = vector.shape_cast %70 : vector<8x32xf32> to vector<1x8x32xf32>
    tpu.vector_store %arg5[%71, %c0_37, %c0_38], %74 {strides = array<i32>} : memref<8x8x32xf32, #tpu.memory_space<vmem>>, vector<1x8x32xf32>,
    %c7_i32 = arith.constant 7 : i32
    %75 = arith.index_cast %c7_i32 : i32 to index
    %c0_39 = arith.constant 0 : index
    %c0_40 = arith.constant 0 : index
    %76 = vector.load %arg2[%75, %c0_39, %c0_40] : memref<8x8x32xf32, #tpu.memory_space<vmem>>, vector<1x8x32xf32>
    %77 = vector.shape_cast %76 : vector<1x8x32xf32> to vector<8x32xf32>
    %cst_41 = arith.constant dense<0.000000e+00> : vector<8x32xf32>
    %78 = tpu.matmul %70, %3, %cst_41 {dimension_numbers = #tpu.dot_dimension_numbers<[1], [0], [0], [1], [0, 0, 1, 1], [], []>} : vector<8x32xf32>, vector<32x32xf32>, vector<8x32xf32> -> vector<8x32xf32>
    %79 = arith.addf %77, %78 : vector<8x32xf32>
    %80 = math.tanh %79 : vector<8x32xf32>
    %81 = arith.index_cast %c7_i32 : i32 to index
    %c0_42 = arith.constant 0 : index
    %c0_43 = arith.constant 0 : index
    %82 = vector.load %arg5[%81, %c0_42, %c0_43] : memref<8x8x32xf32, #tpu.memory_space<vmem>>, vector<1x8x32xf32>
    %83 = vector.shape_cast %82 : vector<1x8x32xf32> to vector<8x32xf32>
    %84 = vector.shape_cast %80 : vector<8x32xf32> to vector<1x8x32xf32>
    tpu.vector_store %arg5[%81, %c0_42, %c0_43], %84 {strides = array<i32>} : memref<8x8x32xf32, #tpu.memory_space<vmem>>, vector<1x8x32xf32>,
    %c8_i32 = arith.constant 8 : i32
    %c0_44 = arith.constant 0 : index
    %c0_45 = arith.constant 0 : index
    %85 = vector.load %arg6[%c0_44, %c0_45] : memref<8x32xf32, #tpu.memory_space<vmem>>, vector<8x32xf32>
    tpu.vector_store %arg6[%c0_44, %c0_45], %80 {strides = array<i32>} : memref<8x32xf32, #tpu.memory_space<vmem>>, vector<8x32xf32>,
    return
  }
  func.func @transform_0(%arg0: i32, %arg1: i32) -> (i32, i32, i32) {
    %c0_i32 = arith.constant 0 : i32
    %c0_i32_0 = arith.constant 0 : i32
    return %arg1, %arg0, %c0_i32 : i32, i32, i32
  }
  func.func @transform_1(%arg0: i32, %arg1: i32) -> (i32, i32) {
    %c0_i32 = arith.constant 0 : i32
    %c0_i32_0 = arith.constant 0 : i32
    %c0_i32_1 = arith.constant 0 : i32
    return %c0_i32, %c0_i32_0 : i32, i32
  }
  func.func @transform_2(%arg0: i32, %arg1: i32) -> (i32, i32) {
    %c0_i32 = arith.constant 0 : i32
    %c0_i32_0 = arith.constant 0 : i32
    return %arg0, %c0_i32 : i32, i32
  }
  func.func @transform_3(%arg0: i32, %arg1: i32) -> (i32, i32, i32) {
    %c0_i32 = arith.constant 0 : i32
    %c0_i32_0 = arith.constant 0 : i32
    return %arg1, %arg0, %c0_i32 : i32, i32, i32
  }
}

</mosaic_0001>

<bundles_post_ra>
// kernel: tpu_custom_call.1
= control target key start
LH: loop header
LB: loop body
LE: loop exit
PB: predicated region body
PF: predicated region fallthrough
CT: control target
= control target key end

     0   :  { %8 = vsyncpa [#allocation4], 0  ;;  %s1117_s0 = inlined_call_operand.hbm [shape: f32[8,8,32], index: 0, kind: input, shape index: {}]   ;;  %s1118_s1 = inlined_call_operand.hbm [shape: f32[32,32], index: 1, kind: input, shape index: {}]   ;;  %s1119_s2 = inlined_call_operand.hbm [shape: f32[8,32], index: 2, kind: input, shape index: {}]   ;;  %s1120_s3 = inlined_call_operand.hbm [shape: f32[8,8,32], index: 3, kind: output, shape index: {}]  }
   0x1   :  { %9 = vsyncpa [#allocation7], 0 }
   0x2   :  { %10 = vsyncpa [#allocation5], 0  ;;  %s962_s12 = smov [#allocation6]   ;;  %s963_s14 = smov [#allocation3]  }
   0x3   :  { %s28_s13 = sshll.u32 %s962_s12, 4  ;;  %s16_s15 = sshll.u32 %s963_s14, 4  ;;  %s29_s13 = int_to_ptr.vmem [resolvable:$true] %s28_s13  ;;  %s17_s15 = int_to_ptr.vmem [resolvable:$true] %s16_s15 }
   0x4   :  { %s884_s16 = scalar_lea.vmem %s29_s13, 512  ;;  %p889_p1 = scmp.lt.s32.totalorder %s29_s13, %s29_s13 }
   0x5   :  { %p885_p0 = scmp.ne.s32.totalorder %s29_s13, %s884_s16  ;;  %p890_p2 = scmp.lt.s32.totalorder %s884_s16, %s884_s16 }
   0x7   :  { %p891_p3 = por %p890_p2, %p889_p1 }
   0x9   :  { %p892_p4 = pnand %p891_p3, %p885_p0 }
   0xb   :  { %895 = shalt.err (!%p892_p4)
}
   0xc   :  { %s964_s17 = smov 128   ;;  %s965_s18 = smov 8  }
   0xd   :  { %34 = dma.hbm_to_vmem [thread:$0]  %s1118_s1, 512, %s29_s13, [#allocation7], %s964_s17, %s964_s17, %s965_s18  }
   0xe   :  { %s904_s21 = scalar_lea.vmem %s17_s15, 1024  ;;  %p909_p6 = scmp.lt.s32.totalorder %s17_s15, %s17_s15 }
   0xf   :  { %p905_p5 = scmp.ne.s32.totalorder %s17_s15, %s904_s21  ;;  %p910_p7 = scmp.lt.s32.totalorder %s904_s21, %s904_s21 }
  0x11   :  { %p911_p8 = por %p910_p7, %p909_p6 }
  0x13   :  { %p912_p9 = pnand %p911_p8, %p905_p5 }
  0x15   :  { %915 = shalt.err (!%p912_p9)
}
  0x16   :  { %22 = dma.hbm_to_vmem [thread:$0]  %s1117_s0, 1024, %s17_s15, [#allocation4], %s964_s17, %s964_s17, %s965_s18  }
  0x17   :  { %s966_s24 = smov [#allocation8]  }
  0x18   :  { %s41_s25 = sshll.u32 %s966_s24, 4  ;;  %s42_s25 = int_to_ptr.vmem [resolvable:$true] %s41_s25 }
  0x19   :  { %s924_s26 = scalar_lea.vmem %s42_s25, 128  ;;  %p929_p11 = scmp.lt.s32.totalorder %s42_s25, %s42_s25 }
  0x1a   :  { %p925_p10 = scmp.ne.s32.totalorder %s42_s25, %s924_s26  ;;  %p930_p12 = scmp.lt.s32.totalorder %s924_s26, %s924_s26 }
  0x1c   :  { %p931_p13 = por %p930_p12, %p929_p11 }
  0x1e   :  { %p932_p0 = pnand %p931_p13, %p925_p10 }
  0x20   :  { %935 = shalt.err (!%p932_p0)
}
  0x21   :  { %44 = dma.hbm_to_vmem [thread:$0]  %s1119_s2, 128, %s42_s25, [#allocation7]  }
  0x22   :  { %956 = dma.done.wait [#allocation4], 1024  }
  0x23   :  { %957 = vsyncadd [#allocation4], 4294966272 }
  0x24   :  { %958 = dma.done.wait [#allocation7], 640  }
  0x25   :  { %959 = vsyncadd [#allocation7], 4294966656  ;;  %v967_v0 = vmov 0.0   ;;  %vm968_vm0 = vmmov 0   ;;  %vm59_vm1 = vcmask 261120   ;;  %v1011_v1 = vld [vmem:[#allocation6 + $0x18] sm:$0xff] }
  0x26   :  { %764 = vmatprep.subr.mxu0 %v967_v0  ;;  %772 = vmatprep.mubr.msk.f32.mxu0 %vm968_vm0, %v967_v0  ;;  %v1013_v2 = vld [vmem:[#allocation6 + $0x10] sm:$0xff]  ;;  %v58_v3 = vld [vmem:[#allocation8] sm:$0xff]  ;;  %v1018_v4 = vld [vmem:[#allocation6 + $0x8] sm:$0xff]  ;;  %s969_s0 = smov [#allocation9]  }
  0x27   :  { %775 = vmatprep.subr.mxu1 %v967_v0  ;;  %783 = vmatprep.mubr.msk.f32.mxu1 %vm968_vm0, %v967_v0  ;;  %60 = vst.msk [vmem:[#allocation2] sm:$0xff] %vm59_vm1, %v58_v3  ;;  %v1025_v5 = vld [vmem:[#allocation6] sm:$0xff]  ;;  %v145_v12 = vld [vmem:[#allocation3 + $0x8] sm:$0xff]  ;;  %v224_v17 = vld [vmem:[#allocation3 + $0x10] sm:$0xff]  ;;  %s703_s2 = sshll.u32 %s969_s0, 4  ;;  %s704_s2 = int_to_ptr.vmem [resolvable:$true] %s703_s2 }
  0x28   :  { %765 = vmatpush3.msra.mxu0 %v1011_v1  ;;  %776 = vmatpush3.msra.mxu1 %v1011_v1  ;;  %v66_v7 = vld [vmem:[#allocation3] sm:$0xff]  ;;  %v303_v22 = vld [vmem:[#allocation3 + $0x18] sm:$0xff]  ;;  %v461_v32 = vld [vmem:[#allocation3 + $0x28] sm:$0xff]  ;;  %s936_s28 = scalar_lea.vmem %s704_s2, 1024  ;;  %p941_p2 = scmp.lt.s32.totalorder %s704_s2, %s704_s2 }
  0x29   :  { %766 = vmatprep.subr.mxu0 %v967_v0  ;;  %777 = vmatprep.subr.mxu1 %v967_v0  ;;  %v382_v27 = vld [vmem:[#allocation3 + $0x20] sm:$0xff]  ;;  %v540_v37 = vld [vmem:[#allocation3 + $0x30] sm:$0xff]  ;;  %v619_v42 = vld [vmem:[#allocation3 + $0x38] sm:$0xff]  ;;  %p937_p1 = scmp.ne.s32.totalorder %s704_s2, %s936_s28  ;;  %p942_p3 = scmp.lt.s32.totalorder %s936_s28, %s936_s28 }
  0x2a   :  { %767 = vmatpush3.msra.mxu0 %v1013_v2  ;;  %778 = vmatpush3.msra.mxu1 %v1013_v2 }
  0x2b   :  { %768 = vmatprep.subr.mxu0 %v967_v0  ;;  %779 = vmatprep.subr.mxu1 %v967_v0  ;;  %p943_p4 = por %p942_p3, %p941_p2 }
  0x2c   :  { %769 = vmatpush3.msra.mxu0 %v1018_v4  ;;  %780 = vmatpush3.msra.mxu1 %v1018_v4 }
  0x2d   :  { %770 = vmatprep.subr.mxu0 %v967_v0  ;;  %781 = vmatprep.subr.mxu1 %v967_v0  ;;  %p944_p5 = pnand %p943_p4, %p937_p1 }
  0x2e   :  { %771 = vmatpush3.msra.mxu0 %v1025_v5  ;;  %782 = vmatpush3.msra.mxu1 %v1025_v5  ;;  %v65_v6 = vld [vmem:[#allocation2] sm:$0xff] }
  0x2f   :  { %786 = vmatprep.subr.mxu0 %v967_v0  ;;  %797 = vmatprep.subr.mxu1 %v967_v0 }
  0x30   :  { %773 = vmatmul.mubr.msk.f32.vlgmr.msra.gmra.mxu0 %vm59_vm1, %v65_v6 }
  0x31   :  { %787 = vmatpush3.msra.mxu0 %v1011_v1  ;;  %794 = vmatprep.mubr.msk.f32.mxu0 %vm968_vm0, %v967_v0 }
  0x32   :  { %788 = vmatprep.subr.mxu0 %v967_v0 }
  0x33   :  { %789 = vmatpush3.msra.mxu0 %v1013_v2 }
  0x34   :  { %790 = vmatprep.subr.mxu0 %v967_v0 }
  0x35   :  { %791 = vmatpush3.msra.mxu0 %v1018_v4 }
  0x36   :  { %792 = vmatprep.subr.mxu0 %v967_v0 }
  0x37   :  { %793 = vmatpush3.msra.mxu0 %v1025_v5 }
  0x38   :  { %808 = vmatprep.subr.mxu0 %v967_v0 }
  0xf0   :  { %v137_v8 = vpop.f32.mrf.mxu0 }
  0xf1   :  { %v141_v9 = vadd.f32 %v137_v8, %v66_v7 }
  0xf2   :  { %v774_v10 = vpop.f32.mrf.mxu0 }
  0xf3   :  { %860 = vtanh.f32 %v141_v9 }
 0x100   :  { %v861_v11 = vpop.eup %860 }
 0x101   :  { %143 = vst.msk [vmem:[#allocation9] sm:$0xff] %vm59_vm1, %v861_v11  ;;  %784 = vmatmul.mubr.msk.f32.vlgmr.msra.gmra.mxu1 %vm59_vm1, %v861_v11 }
 0x102   :  { %798 = vmatpush3.msra.mxu1 %v1011_v1  ;;  %805 = vmatprep.mubr.msk.f32.mxu1 %vm968_vm0, %v967_v0 }
 0x103   :  { %799 = vmatprep.subr.mxu1 %v967_v0 }
 0x104   :  { %800 = vmatpush3.msra.mxu1 %v1013_v2 }
 0x105   :  { %801 = vmatprep.subr.mxu1 %v967_v0 }
 0x106   :  { %802 = vmatpush3.msra.mxu1 %v1018_v4 }
 0x107   :  { %803 = vmatprep.subr.mxu1 %v967_v0 }
 0x108   :  { %804 = vmatpush3.msra.mxu1 %v1025_v5 }
 0x109   :  { %819 = vmatprep.subr.mxu1 %v967_v0 }
 0x1c1   :  { %v215_v13 = vpop.f32.mrf.mxu1 }
 0x1c2   :  { %v219_v14 = vadd.f32 %v215_v13, %v145_v12 }
 0x1c3   :  { %v785_v15 = vpop.f32.mrf.mxu1 }
 0x1c4   :  { %862 = vtanh.f32 %v219_v14 }
 0x1d1   :  { %v863_v16 = vpop.eup %862 }
 0x1d2   :  { %222 = vst.msk [vmem:[#allocation9 + $0x8] sm:$0xff] %vm59_vm1, %v863_v16  ;;  %795 = vmatmul.mubr.msk.f32.vlgmr.msra.gmra.mxu0 %vm59_vm1, %v863_v16 }
 0x1d3   :  { %809 = vmatpush3.msra.mxu0 %v1011_v1  ;;  %816 = vmatprep.mubr.msk.f32.mxu0 %vm968_vm0, %v967_v0 }
 0x1d4   :  { %810 = vmatprep.subr.mxu0 %v967_v0 }
 0x1d5   :  { %811 = vmatpush3.msra.mxu0 %v1013_v2 }
 0x1d6   :  { %812 = vmatprep.subr.mxu0 %v967_v0 }
 0x1d7   :  { %813 = vmatpush3.msra.mxu0 %v1018_v4 }
 0x1d8   :  { %814 = vmatprep.subr.mxu0 %v967_v0 }
 0x1d9   :  { %815 = vmatpush3.msra.mxu0 %v1025_v5 }
 0x1da   :  { %830 = vmatprep.subr.mxu0 %v967_v0 }
 0x292   :  { %v294_v18 = vpop.f32.mrf.mxu0 }
 0x293   :  { %v298_v19 = vadd.f32 %v294_v18, %v224_v17 }
 0x294   :  { %v796_v20 = vpop.f32.mrf.mxu0 }
 0x295   :  { %864 = vtanh.f32 %v298_v19 }
 0x2a2   :  { %v865_v21 = vpop.eup %864 }
 0x2a3   :  { %301 = vst.msk [vmem:[#allocation9 + $0x10] sm:$0xff] %vm59_vm1, %v865_v21  ;;  %806 = vmatmul.mubr.msk.f32.vlgmr.msra.gmra.mxu1 %vm59_vm1, %v865_v21 }
 0x2a4   :  { %820 = vmatpush3.msra.mxu1 %v1011_v1  ;;  %827 = vmatprep.mubr.msk.f32.mxu1 %vm968_vm0, %v967_v0 }
 0x2a5   :  { %821 = vmatprep.subr.mxu1 %v967_v0 }
 0x2a6   :  { %822 = vmatpush3.msra.mxu1 %v1013_v2 }
 0x2a7   :  { %823 = vmatprep.subr.mxu1 %v967_v0 }
 0x2a8   :  { %824 = vmatpush3.msra.mxu1 %v1018_v4 }
 0x2a9   :  { %825 = vmatprep.subr.mxu1 %v967_v0 }
 0x2aa   :  { %826 = vmatpush3.msra.mxu1 %v1025_v5 }
 0x2ab   :  { %841 = vmatprep.subr.mxu1 %v967_v0 }
 0x363   :  { %v373_v23 = vpop.f32.mrf.mxu1 }
 0x364   :  { %v377_v24 = vadd.f32 %v373_v23, %v303_v22 }
 0x365   :  { %v807_v25 = vpop.f32.mrf.mxu1 }
 0x366   :  { %866 = vtanh.f32 %v377_v24 }
 0x373   :  { %v867_v26 = vpop.eup %866 }
 0x374   :  { %380 = vst.msk [vmem:[#allocation9 + $0x18] sm:$0xff] %vm59_vm1, %v867_v26  ;;  %817 = vmatmul.mubr.msk.f32.vlgmr.msra.gmra.mxu0 %vm59_vm1, %v867_v26 }
 0x375   :  { %831 = vmatpush3.msra.mxu0 %v1011_v1  ;;  %838 = vmatprep.mubr.msk.f32.mxu0 %vm968_vm0, %v967_v0 }
 0x376   :  { %832 = vmatprep.subr.mxu0 %v967_v0 }
 0x377   :  { %833 = vmatpush3.msra.mxu0 %v1013_v2 }
 0x378   :  { %834 = vmatprep.subr.mxu0 %v967_v0 }
 0x379   :  { %835 = vmatpush3.msra.mxu0 %v1018_v4 }
 0x37a   :  { %836 = vmatprep.subr.mxu0 %v967_v0 }
 0x37b   :  { %837 = vmatpush3.msra.mxu0 %v1025_v5 }
 0x434   :  { %v452_v28 = vpop.f32.mrf.mxu0 }
 0x435   :  { %v456_v29 = vadd.f32 %v452_v28, %v382_v27 }
 0x436   :  { %v818_v30 = vpop.f32.mrf.mxu0 }
 0x437   :  { %868 = vtanh.f32 %v456_v29 }
 0x444   :  { %v869_v31 = vpop.eup %868 }
 0x445   :  { %459 = vst.msk [vmem:[#allocation9 + $0x20] sm:$0xff] %vm59_vm1, %v869_v31  ;;  %828 = vmatmul.mubr.msk.f32.vlgmr.msra.gmra.mxu1 %vm59_vm1, %v869_v31 }
 0x446   :  { %842 = vmatpush3.msra.mxu1 %v1011_v1  ;;  %849 = vmatprep.mubr.msk.f32.mxu1 %vm968_vm0, %v967_v0 }
 0x447   :  { %843 = vmatprep.subr.mxu1 %v967_v0 }
 0x448   :  { %844 = vmatpush3.msra.mxu1 %v1013_v2 }
 0x449   :  { %845 = vmatprep.subr.mxu1 %v967_v0 }
 0x44a   :  { %846 = vmatpush3.msra.mxu1 %v1018_v4 }
 0x44b   :  { %847 = vmatprep.subr.mxu1 %v967_v0 }
 0x44c   :  { %848 = vmatpush3.msra.mxu1 %v1025_v5 }
 0x505   :  { %v531_v33 = vpop.f32.mrf.mxu1 }
 0x506   :  { %v535_v34 = vadd.f32 %v531_v33, %v461_v32 }
 0x507   :  { %v829_v35 = vpop.f32.mrf.mxu1 }
 0x508   :  { %870 = vtanh.f32 %v535_v34 }
 0x515   :  { %v871_v36 = vpop.eup %870 }
 0x516   :  { %538 = vst.msk [vmem:[#allocation9 + $0x28] sm:$0xff] %vm59_vm1, %v871_v36  ;;  %839 = vmatmul.mubr.msk.f32.vlgmr.msra.gmra.mxu0 %vm59_vm1, %v871_v36 }
 0x5d6   :  { %v610_v38 = vpop.f32.mrf.mxu0 }
 0x5d7   :  { %v614_v39 = vadd.f32 %v610_v38, %v540_v37 }
 0x5d8   :  { %v840_v40 = vpop.f32.mrf.mxu0 }
 0x5d9   :  { %872 = vtanh.f32 %v614_v39 }
 0x5e6   :  { %v873_v41 = vpop.eup %872 }
 0x5e7   :  { %617 = vst.msk [vmem:[#allocation9 + $0x30] sm:$0xff] %vm59_vm1, %v873_v41  ;;  %850 = vmatmul.mubr.msk.f32.vlgmr.msra.gmra.mxu1 %vm59_vm1, %v873_v41 }
 0x6a7   :  { %v689_v43 = vpop.f32.mrf.mxu1 }
 0x6a8   :  { %v693_v44 = vadd.f32 %v689_v43, %v619_v42 }
 0x6a9   :  { %v851_v45 = vpop.f32.mrf.mxu1 }
 0x6aa   :  { %874 = vtanh.f32 %v693_v44 }
 0x6b7   :  { %v875_v46 = vpop.eup %874 }
 0x6b8   :  { %697 = vst.msk [vmem:[#allocation2] sm:$0xff] %vm59_vm1, %v875_v46  ;;  %696 = vst.msk [vmem:[#allocation9 + $0x38] sm:$0xff] %vm59_vm1, %v875_v46 }
 0x6b9   :  { %947 = shalt.err (!%p944_p5)
}
 0x6ba   :  { %709 = dma.vmem_to_hbm [thread:$0]  %s704_s2, 1024, %s1120_s3, [#allocation5], %s964_s17, %s964_s17, %s965_s18  }
 0x6bb   :  { %960 = dma.done.wait [#allocation5], 1024  }
 0x6bc   :  { %961 = vsyncadd [#allocation5], 4294966272 }
 0x6bd   :  { %713 = vsyncpa [#allocation4], 1 }
 0x6be   :  { %714 = vsyncpa [#allocation7], 1 }
 0x6bf   :  { %715 = vsyncpa [#allocation5], 1 }

</bundles_post_ra>
